<compile_context>
chip_gen: v5e
topology: v5e:2x2
jax: 0.10.0
libtpu: 0.0.40
codegen_flags: <defaults>
</compile_context>

<pallas_src>
import jax
import jax.numpy as jnp
from jax import lax
from jax.experimental import pallas as pl
from jax.experimental.pallas import tpu as pltpu

NEG_SLOPE = 0.01   # PyTorch LeakyReLU default
BN_EPS = 1e-5


def _leaky_relu(h):
    return jnp.where(h > 0, h, NEG_SLOPE * h)


def _round_up(x, m):
    return ((x + m - 1) // m) * m


# --------------------------------------------------------------------------
# Kernel
# --------------------------------------------------------------------------
def _stage_body(xb_ref, xh_ref, w1_ref, t1_ref, w2_ref, t2_ref, o_ref,
                xst_ref, im1_ref, im2_ref):
    # xb_ref : (1, Ci, BW)      input body tile (native input dtype)
    # xh_ref : (1, Ci, 128)     next 128 input columns (first 4 = halo), or None
    # w1_ref : (Co, 3*Ci)       conv1 weights, BN1 scale folded, taps stacked on K
    # t1_ref : (Co, 1)          folded conv1 bias + BN1 shift (f32)
    # w2_ref : (Co, 3*Co)
    # t2_ref : (Co, 1)
    # o_ref  : (1, Co, LT)      output tile (out dtype)
    # xst_ref: (Ci, BW[+128])   stitched input, compute dtype
    # im1_ref: (3*Ci, LT+2)     im2col RHS for conv1
    # im2_ref: (3*Co, LT)       im2col RHS for conv2
    cdt = xst_ref.dtype
    Ci = xb_ref.shape[1]
    Co = o_ref.shape[1]
    lt = o_ref.shape[2]
    bw = xb_ref.shape[2]
    l1 = lt + 2

    # Stitch body (+ halo) into one contiguous compute-dtype buffer.
    xst_ref[:, :bw] = xb_ref[0].astype(cdt)
    if xh_ref is not None:                      # static (shape-derived) branch
        xst_ref[:, bw:bw + 128] = xh_ref[0].astype(cdt)

    # ---- Conv1d #1 (valid, k=3): im2col + single MXU matmul (K = 3*Ci).
    for k in range(3):
        im1_ref[k * Ci:(k + 1) * Ci, :] = xst_ref[:, k:k + l1]
    h = jnp.dot(w1_ref[...], im1_ref[...], preferred_element_type=jnp.float32)
    h = _leaky_relu(h + t1_ref[...])            # (Co, lt+2), f32
    hc = h.astype(cdt)

    # ---- Conv1d #2 (valid, k=3): stage hc into the im2col scratch (also
    # bounds the f32 intermediate's vreg lifetime), single matmul (K = 3*Co).
    for k in range(3):
        im2_ref[k * Co:(k + 1) * Co, :] = hc[:, k:k + lt]
    g = jnp.dot(w2_ref[...], im2_ref[...], preferred_element_type=jnp.float32)
    g = _leaky_relu(g + t2_ref[...])

    o_ref[0] = g.astype(o_ref.dtype)


def _kernel_with_halo(xb, xh, w1, t1, w2, t2, o, xst, im1, im2):
    _stage_body(xb, xh, w1, t1, w2, t2, o, xst, im1, im2)


def _kernel_no_halo(xb, w1, t1, w2, t2, o, xst, im1, im2):
    _stage_body(xb, None, w1, t1, w2, t2, o, xst, im1, im2)


# --------------------------------------------------------------------------
# Host-side parameter folding / tiling
# --------------------------------------------------------------------------
def _fold_params(params, compute_dtype):
    """Fold conv bias + inference BatchNorm into (Co, 3*Cin) weights + shift."""
    def fold(w, b, gamma, beta, mean, var):
        Co, Cin, _ = w.shape
        s = gamma / jnp.sqrt(var + BN_EPS)                           # (Co,)
        # row ordering of the im2col RHS is [tap0 ch0..Cin-1, tap1 ..., tap2 ...]
        w_f = (w * s[:, None, None]).transpose(0, 2, 1).reshape(Co, 3 * Cin)
        t_f = (b - mean) * s + beta                                  # (Co,)
        return w_f.astype(compute_dtype), t_f.reshape(-1, 1).astype(jnp.float32)

    w1, t1 = fold(params["w1"], params["b1"], params["bn1_gamma"],
                  params["bn1_beta"], params["bn1_mean"], params["bn1_var"])
    w2, t2 = fold(params["w2"], params["b2"], params["bn2_gamma"],
                  params["bn2_beta"], params["bn2_mean"], params["bn2_var"])
    return w1, t1, w2, t2


def _pick_tile(L_out, Ci, Co, in_bytes, cdt_bytes, out_bytes, max_l_tile,
               vmem_budget_bytes):
    """Largest lane-dense (multiple of 128) L-tile fitting the VMEM budget."""
    cap = _round_up(min(max(128, max_l_tile), _round_up(L_out, 128)), 128)

    def footprint(lt):
        return (2 * Ci * lt * in_bytes                 # body tile (double-buffered)
                + 2 * Ci * 128 * in_bytes              # halo tile
                + 2 * Co * lt * out_bytes              # output tile
                + 2 * 3 * Co * (Ci + Co) * cdt_bytes   # folded w1 + w2
                + Ci * (lt + 128) * cdt_bytes          # stitch scratch
                + 3 * Ci * (lt + 128) * cdt_bytes      # im2col conv1
                + 3 * Co * lt * cdt_bytes              # im2col conv2
                + Co * (lt + 128) * 4)                 # f32 h intermediate
    while cap > 128 and footprint(cap) > vmem_budget_bytes:
        cap -= 128
    return cap


def stage_forward(x, params, *, compute_dtype=jnp.bfloat16, out_dtype=None,
                  max_l_tile=1024, vmem_budget_bytes=12 * 1024 * 1024):
    """x: (N, Ci, L) -> (N, Co, L-4) in `out_dtype` (default = compute_dtype)."""
    N, Ci, L = x.shape
    Co = params["w1"].shape[0]
    L_out = L - 4
    assert L_out >= 1, "need L >= 5 for two valid k=3 convolutions"
    out_dtype = compute_dtype if out_dtype is None else out_dtype

    w1, t1, w2, t2 = _fold_params(params, compute_dtype)

    in_bytes = jnp.dtype(x.dtype).itemsize
    cdt_bytes = jnp.dtype(compute_dtype).itemsize
    out_bytes = jnp.dtype(out_dtype).itemsize
    lt_cap = _pick_tile(L_out, Ci, Co, in_bytes, cdt_bytes, out_bytes,
                        max_l_tile, vmem_budget_bytes)

    if L_out <= lt_cap:
        # Single exact-fit tile: full-dim blocks, no halo input, no masking.
        T, lt, body_w, use_halo = 1, L_out, L, False
    else:
        T = pl.cdiv(L_out, lt_cap)
        lt = min(_round_up(pl.cdiv(L_out, T), 128), lt_cap)   # balanced tiles
        T = pl.cdiv(L_out, lt)
        body_w, use_halo = lt, True

    in_specs = [pl.BlockSpec((1, Ci, body_w), lambda n, t: (n, 0, t))]
    args = [x]
    if use_halo:
        g_tile = lt // 128
        hb_max = pl.cdiv(L, 128) - 1      # clamp so the halo DMA stays in-bounds
        in_specs.append(pl.BlockSpec(
            (1, Ci, 128),
            lambda n, t: (n, 0, jnp.minimum((t + 1) * g_tile, hb_max))))
        args.append(x)
    # NOTE: weight/bias blocks are constant across the grid; Pallas re-uses the
    # resident copy (pl.Buffered(1) would only shave a little VMEM).
    in_specs += [
        pl.BlockSpec(w1.shape, lambda n, t: (0, 0)),
        pl.BlockSpec(t1.shape, lambda n, t: (0, 0)),
        pl.BlockSpec(w2.shape, lambda n, t: (0, 0)),
        pl.BlockSpec(t2.shape, lambda n, t: (0, 0)),
    ]
    args += [w1, t1, w2, t2]

    kernel = _kernel_with_halo if use_halo else _kernel_no_halo
    xst_w = body_w + (128 if use_halo else 0)

    return pl.pallas_call(
        kernel,
        out_shape=jax.ShapeDtypeStruct((N, Co, L_out), out_dtype),
        grid=(N, T),
        in_specs=in_specs,
        out_specs=pl.BlockSpec((1, Co, lt), lambda n, t: (n, 0, t)),
        scratch_shapes=[
            pltpu.VMEM((Ci, xst_w), compute_dtype),        # stitched input
            pltpu.VMEM((3 * Ci, lt + 2), compute_dtype),   # im2col conv1
            pltpu.VMEM((3 * Co, lt), compute_dtype),       # im2col conv2
        ],
        compiler_params=pltpu.CompilerParams(
            dimension_semantics=("parallel", "parallel")),
    )(*args)


# --------------------------------------------------------------------------
# Synthetic parameters + references
# --------------------------------------------------------------------------
def make_params(key, Ci, Co):
    """Deterministic synthetic parameters matching Stage(Ci, Co).__init__ shapes."""
    ks = jax.random.split(key, 10)
    return {
        "w1": jax.random.normal(ks[0], (Co, Ci, 3), jnp.float32) * 0.2,
        "b1": jax.random.normal(ks[1], (Co,), jnp.float32) * 0.1,
        "bn1_gamma": 1.0 + 0.1 * jax.random.normal(ks[2], (Co,), jnp.float32),
        "bn1_beta": 0.1 * jax.random.normal(ks[3], (Co,), jnp.float32),
        "bn1_mean": 0.05 * jax.random.normal(ks[4], (Co,), jnp.float32),
        "bn1_var": 1.0 + 0.1 * jax.random.uniform(ks[5], (Co,), jnp.float32),
        "w2": jax.random.normal(ks[6], (Co, Co, 3), jnp.float32) * 0.2,
        "b2": jax.random.normal(ks[7], (Co,), jnp.float32) * 0.1,
        "bn2_gamma": 1.0 + 0.1 * jax.random.normal(ks[8], (Co,), jnp.float32),
        "bn2_beta": 0.1 * jax.random.normal(ks[9], (Co,), jnp.float32),
        "bn2_mean": jnp.zeros((Co,), jnp.float32),
        "bn2_var": jnp.ones((Co,), jnp.float32),
    }


def stage_reference(x, params):
    """Pure-JAX f32 reference (lax conv), faithful to the PyTorch module (eval, p=0)."""
    dn = lax.conv_dimension_numbers(x.shape, params["w1"].shape,
                                    ("NCH", "OIH", "NCH"))

    def bn(h, g, b, m, v):
        return (h - m[None, :, None]) / jnp.sqrt(v[None, :, None] + BN_EPS) \
               * g[None, :, None] + b[None, :, None]

    h = lax.conv_general_dilated(x, params["w1"], (1,), "VALID",
                                 dimension_numbers=dn)
    h = h + params["b1"][None, :, None]
    h = bn(h, params["bn1_gamma"], params["bn1_beta"],
           params["bn1_mean"], params["bn1_var"])
    h = _leaky_relu(h)

    dn2 = lax.conv_dimension_numbers(h.shape, params["w2"].shape,
                                     ("NCH", "OIH", "NCH"))
    g = lax.conv_general_dilated(h, params["w2"], (1,), "VALID",
                                 dimension_numbers=dn2)
    g = g + params["b2"][None, :, None]
    g = bn(g, params["bn2_gamma"], params["bn2_beta"],
           params["bn2_mean"], params["bn2_var"])
    return _leaky_relu(g)


def stage_reference_folded(x, params, compute_dtype):
    """Reference using exactly the folded / low-precision operands the kernel sees."""
    w1, t1, w2, t2 = _fold_params(params, compute_dtype)

    def conv3(z, w_r):
        Co = w_r.shape[0]
        Cin = z.shape[1]
        w3 = w_r.reshape(Co, 3, Cin)
        l1 = z.shape[-1] - 2
        acc = jnp.einsum("oc,ncl->nol", w3[:, 0], z[:, :, 0:l1],
                         preferred_element_type=jnp.float32)
        for k in (1, 2):
            acc = acc + jnp.einsum("oc,ncl->nol", w3[:, k], z[:, :, k:k + l1],
                                   preferred_element_type=jnp.float32)
        return acc

    xc = x.astype(compute_dtype)
    h = _leaky_relu(conv3(xc, w1) + t1[None])
    h = h.astype(compute_dtype)
    return _leaky_relu(conv3(h, w2) + t2[None])


# --------------------------------------------------------------------------
# Self-test
# --------------------------------------------------------------------------
if __name__ == "__main__":
    key = jax.random.PRNGKey(0)
    kx, kp, kx2 = jax.random.split(key, 3)

    # ---- Test 1: tiny shapes (single exact-fit tile path) ------------------
    N, Ci, Co, L = 2, 4, 8, 16                  # output length = 16 - 4 = 12
    x = jax.random.normal(kx, (N, Ci, L), jnp.float32)
    params = make_params(kp, Ci, Co)
    ref = jax.block_until_ready(stage_reference(x, params))

    # Strict correctness gate: f32 compute path vs the PyTorch-faithful reference.
    out_f32 = jax.block_until_ready(
        stage_forward(x, params, compute_dtype=jnp.float32))
    assert out_f32.shape == (N, Co, L - 4), out_f32.shape
    assert out_f32.dtype == jnp.float32
    err = float(jnp.max(jnp.abs(out_f32 - ref)))
    assert err < 1e-3, err

    # Performance path: bf16 operands, bf16 output, f32 MXU accumulation,
    # checked against a reference built from the same folded bf16 operands.
    out_bf16 = jax.block_until_ready(
        stage_forward(x, params, compute_dtype=jnp.bfloat16))
    assert out_bf16.shape == (N, Co, L - 4), out_bf16.shape
    assert out_bf16.dtype == jnp.bfloat16
    ref_bf16 = stage_reference_folded(x, params, jnp.bfloat16).astype(jnp.bfloat16)
    err_b = float(jnp.max(jnp.abs(out_bf16.astype(jnp.float32)
                                  - ref_bf16.astype(jnp.float32))))
    assert err_b < 5e-2, err_b

    # ---- Test 2: multi-tile path (halo, clamped halo index, masked last tile)
    L2 = 300                                    # L_out = 296 -> 3 tiles of 128
    x2 = jax.random.normal(kx2, (N, Ci, L2), jnp.float32)
    ref2 = jax.block_until_ready(stage_reference(x2, params))
    out2 = jax.block_until_ready(
        stage_forward(x2, params, compute_dtype=jnp.float32, max_l_tile=128))
    assert out2.shape == (N, Co, L2 - 4), out2.shape
    err2 = float(jnp.max(jnp.abs(out2 - ref2)))
    assert err2 < 1e-3, err2

    print("KERNEL_OK")
</pallas_src>

<mosaic_0001>
module attributes {stable_mosaic.version = 11 : i64} {
  func.func @_kernel_no_halo(%arg0: i32, %arg1: i32, %arg2: memref<1x4x16xf32, #tpu.memory_space<vmem>>, %arg3: memref<8x12xf32, #tpu.memory_space<vmem>>, %arg4: memref<8x1xf32, #tpu.memory_space<vmem>>, %arg5: memref<8x24xf32, #tpu.memory_space<vmem>>, %arg6: memref<8x1xf32, #tpu.memory_space<vmem>>, %arg7: memref<1x8x12xf32, #tpu.memory_space<vmem>>, %arg8: memref<4x16xf32, #tpu.memory_space<vmem>>, %arg9: memref<12x14xf32, #tpu.memory_space<vmem>>, %arg10: memref<24x12xf32, #tpu.memory_space<vmem>>) attributes {dimension_semantics = [#tpu.dimension_semantics<parallel>, #tpu.dimension_semantics<parallel>], iteration_bounds = array<i64: 2, 1>, scalar_prefetch = 0 : i64, scratch_operands = 3 : i64, tpu.core_type = #tpu.core_type<tc>, window_params = [{transform_indices = @transform_0, window_bounds = array<i64: 1, 4, 16>}, {pipeline_mode = #tpu.pipeline_mode<synchronous>, transform_indices = @transform_1, window_bounds = array<i64: 8, 12>}, {pipeline_mode = #tpu.pipeline_mode<synchronous>, transform_indices = @transform_2, window_bounds = array<i64: 8, 1>}, {pipeline_mode = #tpu.pipeline_mode<synchronous>, transform_indices = @transform_3, window_bounds = array<i64: 8, 24>}, {pipeline_mode = #tpu.pipeline_mode<synchronous>, transform_indices = @transform_4, window_bounds = array<i64: 8, 1>}, {transform_indices = @transform_5, window_bounds = array<i64: 1, 8, 12>}]} {
    %c0 = arith.constant 0 : index
    %c0_0 = arith.constant 0 : index
    %c0_1 = arith.constant 0 : index
    %0 = vector.load %arg2[%c0, %c0_0, %c0_1] : memref<1x4x16xf32, #tpu.memory_space<vmem>>, vector<1x4x16xf32>
    %1 = vector.shape_cast %0 : vector<1x4x16xf32> to vector<4x16xf32>
    %c0_2 = arith.constant 0 : index
    %c0_3 = arith.constant 0 : index
    %2 = vector.load %arg8[%c0_2, %c0_3] : memref<4x16xf32, #tpu.memory_space<vmem>>, vector<4x16xf32>
    tpu.vector_store %arg8[%c0_2, %c0_3], %1 {strides = array<i32>} : memref<4x16xf32, #tpu.memory_space<vmem>>, vector<4x16xf32>,
    %c0_4 = arith.constant 0 : index
    %c0_5 = arith.constant 0 : index
    %3 = vector.load %arg8[%c0_4, %c0_5] : memref<4x16xf32, #tpu.memory_space<vmem>>, vector<4x14xf32>
    %c0_6 = arith.constant 0 : index
    %c0_7 = arith.constant 0 : index
    %4 = vector.load %arg9[%c0_6, %c0_7] : memref<12x14xf32, #tpu.memory_space<vmem>>, vector<4x14xf32>
    tpu.vector_store %arg9[%c0_6, %c0_7], %3 {strides = array<i32>} : memref<12x14xf32, #tpu.memory_space<vmem>>, vector<4x14xf32>,
    %c0_8 = arith.constant 0 : index
    %c1 = arith.constant 1 : index
    %5 = vector.load %arg8[%c0_8, %c1] : memref<4x16xf32, #tpu.memory_space<vmem>>, vector<4x14xf32>
    %c4 = arith.constant 4 : index
    %c0_9 = arith.constant 0 : index
    %6 = vector.load %arg9[%c4, %c0_9] : memref<12x14xf32, #tpu.memory_space<vmem>>, vector<4x14xf32>
    tpu.vector_store %arg9[%c4, %c0_9], %5 {strides = array<i32>} : memref<12x14xf32, #tpu.memory_space<vmem>>, vector<4x14xf32>,
    %c0_10 = arith.constant 0 : index
    %c2 = arith.constant 2 : index
    %7 = vector.load %arg8[%c0_10, %c2] : memref<4x16xf32, #tpu.memory_space<vmem>>, vector<4x14xf32>
    %c8 = arith.constant 8 : index
    %c0_11 = arith.constant 0 : index
    %8 = vector.load %arg9[%c8, %c0_11] : memref<12x14xf32, #tpu.memory_space<vmem>>, vector<4x14xf32>
    tpu.vector_store %arg9[%c8, %c0_11], %7 {strides = array<i32>} : memref<12x14xf32, #tpu.memory_space<vmem>>, vector<4x14xf32>,
    %c0_12 = arith.constant 0 : index
    %c0_13 = arith.constant 0 : index
    %9 = vector.load %arg3[%c0_12, %c0_13] : memref<8x12xf32, #tpu.memory_space<vmem>>, vector<8x12xf32>
    %c0_14 = arith.constant 0 : index
    %c0_15 = arith.constant 0 : index
    %10 = vector.load %arg9[%c0_14, %c0_15] : memref<12x14xf32, #tpu.memory_space<vmem>>, vector<12x14xf32>
    %cst = arith.constant dense<0.000000e+00> : vector<8x14xf32>
    %11 = tpu.matmul %9, %10, %cst {dimension_numbers = #tpu.dot_dimension_numbers<[1], [0], [0], [1], [0, 0, 1, 1], [], []>} : vector<8x12xf32>, vector<12x14xf32>, vector<8x14xf32> -> vector<8x14xf32>
    %c0_16 = arith.constant 0 : index
    %c0_17 = arith.constant 0 : index
    %12 = vector.load %arg4[%c0_16, %c0_17] : memref<8x1xf32, #tpu.memory_space<vmem>>, vector<8x1xf32>
    %13 = vector.broadcast %12 : vector<8x1xf32> to vector<8x14xf32>
    %14 = arith.addf %11, %13 : vector<8x14xf32>
    %cst_18 = arith.constant 0.000000e+00 : f32
    %15 = vector.broadcast %cst_18 : f32 to vector<8x14xf32>
    %16 = arith.cmpf ogt, %14, %15 : vector<8x14xf32>
    %cst_19 = arith.constant 0.00999999977 : f32
    %17 = vector.broadcast %cst_19 : f32 to vector<8x14xf32>
    %18 = arith.mulf %17, %14 : vector<8x14xf32>
    %19 = arith.select %16, %14, %18 : vector<8x14xi1>, vector<8x14xf32>
    %20 = vector.extract_strided_slice %19 {offsets = [0, 0], sizes = [8, 12], strides = [1, 1]} : vector<8x14xf32> to vector<8x12xf32>
    %c0_20 = arith.constant 0 : index
    %c0_21 = arith.constant 0 : index
    %21 = vector.load %arg10[%c0_20, %c0_21] : memref<24x12xf32, #tpu.memory_space<vmem>>, vector<8x12xf32>
    tpu.vector_store %arg10[%c0_20, %c0_21], %20 {strides = array<i32>} : memref<24x12xf32, #tpu.memory_space<vmem>>, vector<8x12xf32>,
    %22 = vector.extract_strided_slice %19 {offsets = [0, 1], sizes = [8, 12], strides = [1, 1]} : vector<8x14xf32> to vector<8x12xf32>
    %c8_22 = arith.constant 8 : index
    %c0_23 = arith.constant 0 : index
    %23 = vector.load %arg10[%c8_22, %c0_23] : memref<24x12xf32, #tpu.memory_space<vmem>>, vector<8x12xf32>
    tpu.vector_store %arg10[%c8_22, %c0_23], %22 {strides = array<i32>} : memref<24x12xf32, #tpu.memory_space<vmem>>, vector<8x12xf32>,
    %24 = vector.extract_strided_slice %19 {offsets = [0, 2], sizes = [8, 12], strides = [1, 1]} : vector<8x14xf32> to vector<8x12xf32>
    %c16 = arith.constant 16 : index
    %c0_24 = arith.constant 0 : index
    %25 = vector.load %arg10[%c16, %c0_24] : memref<24x12xf32, #tpu.memory_space<vmem>>, vector<8x12xf32>
    tpu.vector_store %arg10[%c16, %c0_24], %24 {strides = array<i32>} : memref<24x12xf32, #tpu.memory_space<vmem>>, vector<8x12xf32>,
    %c0_25 = arith.constant 0 : index
    %c0_26 = arith.constant 0 : index
    %26 = vector.load %arg5[%c0_25, %c0_26] : memref<8x24xf32, #tpu.memory_space<vmem>>, vector<8x24xf32>
    %c0_27 = arith.constant 0 : index
    %c0_28 = arith.constant 0 : index
    %27 = vector.load %arg10[%c0_27, %c0_28] : memref<24x12xf32, #tpu.memory_space<vmem>>, vector<24x12xf32>
    %cst_29 = arith.constant dense<0.000000e+00> : vector<8x12xf32>
    %28 = tpu.matmul %26, %27, %cst_29 {dimension_numbers = #tpu.dot_dimension_numbers<[1], [0], [0], [1], [0, 0, 1, 1], [], []>} : vector<8x24xf32>, vector<24x12xf32>, vector<8x12xf32> -> vector<8x12xf32>
    %c0_30 = arith.constant 0 : index
    %c0_31 = arith.constant 0 : index
    %29 = vector.load %arg6[%c0_30, %c0_31] : memref<8x1xf32, #tpu.memory_space<vmem>>, vector<8x1xf32>
    %30 = vector.broadcast %29 : vector<8x1xf32> to vector<8x12xf32>
    %31 = arith.addf %28, %30 : vector<8x12xf32>
    %cst_32 = arith.constant 0.000000e+00 : f32
    %32 = vector.broadcast %cst_32 : f32 to vector<8x12xf32>
    %33 = arith.cmpf ogt, %31, %32 : vector<8x12xf32>
    %cst_33 = arith.constant 0.00999999977 : f32
    %34 = vector.broadcast %cst_33 : f32 to vector<8x12xf32>
    %35 = arith.mulf %34, %31 : vector<8x12xf32>
    %36 = arith.select %33, %31, %35 : vector<8x12xi1>, vector<8x12xf32>
    %c0_34 = arith.constant 0 : index
    %c0_35 = arith.constant 0 : index
    %c0_36 = arith.constant 0 : index
    %37 = vector.load %arg7[%c0_34, %c0_35, %c0_36] : memref<1x8x12xf32, #tpu.memory_space<vmem>>, vector<1x8x12xf32>
    %38 = vector.shape_cast %37 : vector<1x8x12xf32> to vector<8x12xf32>
    %39 = vector.shape_cast %36 : vector<8x12xf32> to vector<1x8x12xf32>
    tpu.vector_store %arg7[%c0_34, %c0_35, %c0_36], %39 {strides = array<i32>} : memref<1x8x12xf32, #tpu.memory_space<vmem>>, vector<1x8x12xf32>,
    return
  }
  func.func @transform_0(%arg0: i32, %arg1: i32) -> (i32, i32, i32) {
    %c0_i32 = arith.constant 0 : i32
    %c0_i32_0 = arith.constant 0 : i32
    return %arg0, %c0_i32, %arg1 : i32, i32, i32
  }
  func.func @transform_1(%arg0: i32, %arg1: i32) -> (i32, i32) {
    %c0_i32 = arith.constant 0 : i32
    %c0_i32_0 = arith.constant 0 : i32
    %c0_i32_1 = arith.constant 0 : i32
    return %c0_i32, %c0_i32_0 : i32, i32
  }
  func.func @transform_2(%arg0: i32, %arg1: i32) -> (i32, i32) {
    %c0_i32 = arith.constant 0 : i32
    %c0_i32_0 = arith.constant 0 : i32
    %c0_i32_1 = arith.constant 0 : i32
    return %c0_i32, %c0_i32_0 : i32, i32
  }
  func.func @transform_3(%arg0: i32, %arg1: i32) -> (i32, i32) {
    %c0_i32 = arith.constant 0 : i32
    %c0_i32_0 = arith.constant 0 : i32
    %c0_i32_1 = arith.constant 0 : i32
    return %c0_i32, %c0_i32_0 : i32, i32
  }
  func.func @transform_4(%arg0: i32, %arg1: i32) -> (i32, i32) {
    %c0_i32 = arith.constant 0 : i32
    %c0_i32_0 = arith.constant 0 : i32
    %c0_i32_1 = arith.constant 0 : i32
    return %c0_i32, %c0_i32_0 : i32, i32
  }
  func.func @transform_5(%arg0: i32, %arg1: i32) -> (i32, i32, i32) {
    %c0_i32 = arith.constant 0 : i32
    %c0_i32_0 = arith.constant 0 : i32
    return %arg0, %c0_i32, %arg1 : i32, i32, i32
  }
}

</mosaic_0001>

<bundles_post_ra>
// kernel: tpu_custom_call.1
= control target key start
LH: loop header
LB: loop body
LE: loop exit
PB: predicated region body
PF: predicated region fallthrough
CT: control target
= control target key end

     0   :  { %10 = vsyncpa [#allocation6], 0  ;;  %s818_s0 = inlined_call_operand.vmem [shape: f32[2,4,16], index: 0, kind: input, shape index: {}]   ;;  %s819_s1 = inlined_call_operand.vmem [shape: f32[8,12], index: 1, kind: input, shape index: {}]   ;;  %s820_s2 = inlined_call_operand.vmem [shape: f32[8,1], index: 2, kind: input, shape index: {}]   ;;  %s821_s3 = inlined_call_operand.hbm [shape: f32[8,24], index: 3, kind: input, shape index: {}]   ;;  %s822_s4 = inlined_call_operand.vmem [shape: f32[8,1], index: 4, kind: input, shape index: {}]   ;;  %s823_s5 = inlined_call_operand.hbm [shape: f32[2,8,12], index: 5, kind: output, shape index: {}]  }
   0x1   :  { %11 = vsyncpa [#allocation7], 0 }
   0x2   :  { %13 = vsyncpa [#allocation7 + $0x1], 0  ;;  %s702_s18 = smov 0   ;;  %s704_s19 = smov 0  }
   0x3   :  { %s706_s20 = smov 0   ;;  %s708_s21 = smov 0  }
   0x4   :  { %s710_s22 = smov 0   ;;  %s712_s23 = smov 0  }
   0x5 LB: > { %s466_s24 = sadd.s32 4294967295, %s666_s23   ;;  %s467_s25 = sadd.s32 4294967294, %s666_s23   ;;  %s666_s23 = sphi %s712_s23, %s19_s23   ;;  %s662_s22 = sphi %s710_s22, %s830_s22   ;;  %s658_s21 = sphi %s708_s21, %s829_s21   ;;  %s654_s20 = sphi %s706_s20, %s828_s20   ;;  %s650_s19 = sphi %s704_s19, %s827_s19   ;;  %s646_s18 = sphi %s702_s18, %s826_s18  }
   0x6   : > { %s31_s26 = sadd.s32 1, %s662_s22  ;;  %s152_s27 = sadd.s32 1, %s654_s20 }
   0x7   : > { %p33_p0 = scmp.ge.s32.totalorder %s31_s26, 2  ;;  %p162_p1 = scmp.ne.s32.totalorder %s654_s20, %s650_s19 }
   0x8   : > { %p163_p2 = scmp.eq.s32.totalorder %s466_s24, 1  ;;  %p168_p3 = scmp.ne.s32.totalorder %s650_s19, %s646_s18 }
   0x9   : > { %s832_s26 = smov (%p33_p0, %s31_s26), 0  ;;  %p169_p5 = scmp.eq.s32.totalorder %s467_s25, 1 }
   0xa   : > { %p742_p4 = por %p163_p2, %p162_p1  ;;  %s147_s29 = ssub.s32 %s662_s22, %s832_s26 }
   0xb   : > { %p468_p6 = scmp.ge.s32.totalorder %s666_s23, 1  ;;  %p150_p7 = scmp.eq.s32.totalorder %s147_s29, 0 }
   0xc   : > { %p749_p8 = por %p169_p5, %p168_p3  ;;  %p176_p9 = scmp.lt.s32.totalorder %s666_s23, 3 }
   0xd   : > { %s755_s6 = scalar_select %p150_p7, %s654_s20, %s152_s27  }
   0xe   : > { %p177_p10 = pnand %p468_p6, %p176_p9  ;;  %p496_p11 = scmp.eq.s32.totalorder %s466_s24, 0 }
   0xf   : > { %s194_s9 = sshll.u32 %s821_s3, 4  ;;  %s668_s10 = smov [#allocation5]   ;;  %s195_s9 = int_to_ptr.hbm [resolvable:$true] %s194_s9 }
  0x10   : > { %p488_p12 = pneg %p177_p10  ;;  %s196_s11 = sshll.u32 %s668_s10, 4  ;;  %s197_s11 = int_to_ptr.vmem [resolvable:$true] %s196_s11 }
  0x11   : > { %222 = sbr.rel (%p177_p10) target bundleno = 563 (0x233), region = 40 }
  0x12   : > { %p489_p13 = pnand %p496_p11, %p488_p12 }
  0x14   : > { %491 = dma.hbm_to_vmem [thread:$0]  (!%p489_p13), %s195_s9, 128, %s197_s11, [#allocation6]  }
  0x16   : > { %637 = dma.done.wait (%p496_p11), [#allocation6], 128  }
  0x17   : > { %639 = vsyncadd (%p496_p11), [#allocation6], 4294967168  ;;  %p253_p0 = scmp.lt.s32.totalorder %s658_s21, 1  ;;  %vm261_vm0 = vcmask 125952   ;;  %s669_s17 = smov 126   ;;  %vm264_vm1 = vcmask 109568  }
  0x18   : > { %s670_s24 = smov 127   ;;  %v281_v4 = vld [vmem:[%s820_s2] sm:$0xff]  ;;  %v671_v5 = vmov 0   ;;  %vm291_vm2 = vcmask 1043456   ;;  %vm287_vm3 = vcmask 97280   ;;  %v328_v21 = vld [vmem:[#allocation5] sm:$0xff] }
  0x19   : > { %s254_s12 = scalar_select %p253_p0, %s658_s21, 1  ;;  %551 = vset.pattern.permute.xlu1 %v671_v5  ;;  %552 = vset.pattern.permute.xlu2 %v671_v5  ;;  %v278_v9 = vld [vmem:[%s819_s1] sm:$0xff]  ;;  %vm338_vm5 = vcmask 195584  }
  0x1a   : > { %284 = vperm.xlu1 %551, %v281_v4   ;;  %553 = vset.pattern.permute.xlu0 %v671_v5  ;;  %v332_v17 = vld [vmem:[%s822_s4] sm:$0xff]  ;;  %s250_s10 = sand.u32 1, %s650_s19   ;;  %s604_s8 = scalar_lea.hbm %s823_s5, 16 }
  0x1b   : > { %s474_s13 = sshll.u32 %s254_s12, 2  ;;  %s473_s11 = sshll.u32 %s250_s10, 3 }
  0x1c   : > { %s259_s16 = scalar_lea.vmem %s818_s0, %s474_s13  ;;  %s479_s12 = sshll.u32 %s658_s21, 3 }
  0x1d   : > { %v260_v0 = vld [vmem:[%s259_s16] sm:$0xf]  ;;  %s378_s15 = scalar_lea.hbm %s823_s5, %s479_s12  ;;  %s252_s16 = scalar_lea.vmem [#allocation8], %s473_s11 }
  0x1e   : > { %262 = vst.msk [vmem:[#allocation2] sm:$0xf] %vm261_vm0, %v260_v0  ;;  %s367_s25 = scalar_lea.sflag [#allocation7], %s250_s10 }
  0x25   : > { %v272_v1 = vld [vmem:[#allocation2] sm:$0xf] }
  0x26   : > { %274 = vrot.lane.b32.xlu0 %v272_v1, %s669_s17  ;;  %v266_v2 = vld [vmem:[#allocation2] sm:$0xf] }
  0x27   : > { %v263_v3 = vld [vmem:[#allocation2] sm:$0xf] }
  0x28   : > { %265 = vst.msk [vmem:[#allocation3] sm:$0xf] %vm264_vm1, %v263_v3 }
  0x2e   : > { %268 = vrot.lane.b32.xlu0 %v266_v2, %s670_s24 }
  0x8c   : > { %v285_v11 = vpop.permute.xlu1 %284 }
  0x98   : > { %v275_v6 = vpop.permute.xlu0 %274 }
  0x99   : > { %277 = vst.msk [vmem:[#allocation3 + $0x8] sm:$0xf] %vm264_vm1, %v275_v6 }
  0xa0   : > { %v269_v7 = vpop.permute.xlu0 %268  ;;  %v280_v8 = vld [vmem:[#allocation3 + $0x8] sm:$0xf] }
  0xa1   : > { %271 = vst.msk [vmem:[#allocation3 + $0x4] sm:$0xf] %vm264_vm1, %v269_v7  ;;  %475 = vmatpush.msk.msra.mxu0 %vm291_vm2, %v280_v8 }
  0xa8   : > { %v279_v10 = vld [vmem:[#allocation3] sm:$0xff] }
  0xa9   : > { %310 = vmatpush.msra.mxu0 %v279_v10 }
  0xaa   : > { %476 = vmatmul.msk.f32.vlgmr.msra.gmra.mxu0 %vm287_vm3, %v278_v9 }
 0x127   : > { %v312_v12 = vpop.f32.mrf.mxu0 }
 0x128   : > { %v313_v13 = vadd.f32 %v312_v12, %v285_v11 }
 0x12a   : > { %v316_v14 = vmul.f32 0.01, %v313_v13  ;;  %vm315_vm4 = vcmp.gt.f32.partialorder %v313_v13, 0.0 }
 0x12c   : > { %v317_v15 = vsel %vm315_vm4, %v313_v13, %v316_v14 }
 0x12d   : > { %320 = vrot.lane.b32.xlu2 %v317_v15, %s670_s24  ;;  %318 = vst.msk [vmem:[#allocation4] sm:$0xff] %vm287_vm3, %v317_v15  ;;  %324 = vrot.lane.b32.xlu1 %v317_v15, %s669_s17  ;;  %s380_s17 = sshll.u32 %s252_s16, 4  ;;  %s382_s24 = sshll.u32 %s378_s15, 4  ;;  %s381_s17 = int_to_ptr.vmem [resolvable:$true] %s380_s17  ;;  %s383_s24 = int_to_ptr.hbm [resolvable:$true] %s382_s24 }
 0x12e   : > { %s598_s21 = sshra.s32 %s383_s24, 4  ;;  %s599_s21 = int_to_ptr.hbm [resolvable:$true] %s598_s21 }
 0x12f   : > { %s600_s27 = scalar_lea.hbm %s599_s21, 8  ;;  %p605_p5 = scmp.lt.s32.totalorder %s599_s21, %s823_s5 }
 0x130   : > { %p601_p1 = scmp.ne.s32.totalorder %s599_s21, %s600_s27  ;;  %p606_p6 = scmp.lt.s32.totalorder %s604_s8, %s600_s27 }
 0x132   : > { %p602_p2 = pnand %p601_p1, %p742_p4  ;;  %p607_p7 = por %p606_p6, %p605_p5 }
 0x134   : > { %v329_v22 = vld [vmem:[#allocation4] sm:$0xff]  ;;  %p603_p3 = pneg %p602_p2 }
 0x135   : > { %335 = vperm.xlu2 %552, %v332_v17  }
 0x136   : > { %p608_p9 = pnand %p607_p7, %p603_p3 }
 0x187   : > { %v321_v16 = vpop.permute.xlu2 %320 }
 0x188   : > { %323 = vst.msk [vmem:[#allocation4 + $0x8] sm:$0xff] %vm287_vm3, %v321_v16 }
 0x18f   : > { %v330_v20 = vld [vmem:[#allocation4 + $0x8] sm:$0xff]  ;;  %v336_v23 = vpop.permute.xlu2 %335 }
 0x19f   : > { %v325_v18 = vpop.permute.xlu1 %324 }
 0x1a0   : > { %327 = vst.msk [vmem:[#allocation4 + $0x10] sm:$0xff] %vm287_vm3, %v325_v18 }
 0x1a7   : > { %v331_v19 = vld [vmem:[#allocation4 + $0x10] sm:$0xff] }
 0x1a8   : > { %355 = vmatpush.msra.mxu1 %v331_v19 }
 0x1aa   : > { %356 = vmatpush.msra.mxu1 %v330_v20 }
 0x1ac   : > { %357 = vmatpush.msra.mxu1 %v329_v22 }
 0x1ad   : > { %477 = vmatmul.msk.f32.vlgmr.msra.gmra.mxu1 %vm338_vm5, %v328_v21 }
 0x22a   : > { %v359_v24 = vpop.f32.mrf.mxu1 }
 0x22b   : > { %v360_v25 = vadd.f32 %v359_v24, %v336_v23 }
 0x22d   : > { %vm362_vm6 = vcmp.gt.f32.partialorder %v360_v25, 0.0  ;;  %v363_v26 = vmul.f32 0.01, %v360_v25 }
 0x22f   : > { %v364_v27 = vsel %vm362_vm6, %v360_v25, %v363_v26 }
 0x230   : > { %365 = vst.msk [vmem:[%s252_s16] sm:$0xff] %vm287_vm3, %v364_v27 }
 0x231   : > { %611 = shalt.err (!%p608_p9)
}
 0x232   : > { %486 = dma.vmem_to_hbm [thread:$0]  (%p742_p4), %s381_s17, 128, %s383_s24, %s367_s25  }
 0x233 PF: > { %p498_p10 = scmp.ge.s32.totalorder %s666_s23, 2  ;;  %s394_s10 = sand.u32 1, %s646_s18  }
 0x234   : > { %s395_s12 = scalar_lea.sflag [#allocation7], %s394_s10 }
 0x235   : > { %p493_p11 = pnand %p498_p10, %p749_p8 }
 0x237   : > { %p494_p12 = pneg %p493_p11 }
 0x239   : > { %641 = dma.done.wait (%p494_p12), %s395_s12, 128  }
 0x23a   : > { %643 = vsyncadd (%p494_p12), %s395_s12, 4294967168  ;;  %s19_s23 = sadd.s32 1, %s666_s23   ;;  %s826_s18 = smov %s650_s19 }
 0x23b   : > { %p16_p13 = scmp.ge.s32.totalorder %s19_s23, 4   ;;  %s827_s19 = smov %s654_s20 }
 0x23c   : > { %s828_s20 = smov %s755_s6  ;;  %s829_s21 = smov %s662_s22 }
 0x23d   : > { %s830_s22 = smov %s832_s26  ;;  %18 = sbr.rel (!%p16_p13) target bundleno = 5 (0x5), region = 80 }
 0x242   :  { %401 = vsyncpa [#allocation6], 1 }
 0x243   :  { %403 = vsyncpa [#allocation6 + $0x1], 1 }
 0x244   :  { %404 = vsyncpa [#allocation7], 1 }
 0x245   :  { %406 = vsyncpa [#allocation7 + $0x1], 1 }

</bundles_post_ra>
